<compile_context>
chip_gen: v7x
topology: tpu7x:2x2x1
jax: 0.10.0
libtpu: 0.0.40
codegen_flags: <defaults>
</compile_context>

<pallas_src>
import jax
import jax.numpy as jnp
from jax.experimental import pallas as pl
from jax.experimental.pallas import tpu as pltpu


# ----------------------------------------------------------------------------
# Pallas kernel: identity pass-through over one (block_rows, dim) tile.
# TODO(synk): ContextEncoder.forward() is an empty stub (returns None); this
# identity body is only the scaffold a real context-encoding would replace.
# ----------------------------------------------------------------------------
def _context_identity_kernel(ctx_ref, out_ref):
    out_ref[...] = ctx_ref[...]


def _passthrough_impl(ctx: jax.Array, block_rows: int) -> jax.Array:
    b, d = ctx.shape
    # Batch-tiled grid: block rows a multiple of 8 (sublane) when the batch
    # divides cleanly, `dim` kept whole on the lane axis (lane-dense when
    # d % 128 == 0). Falls back to one full-array block, which is always legal.
    bb = min(b, block_rows)
    if b % bb != 0 or bb % 8 != 0:
        bb = b
    grid = (pl.cdiv(b, bb),)
    return pl.pallas_call(
        _context_identity_kernel,
        out_shape=jax.ShapeDtypeStruct((b, d), ctx.dtype),
        grid=grid,
        in_specs=[pl.BlockSpec((bb, d), lambda i: (i, 0))],
        out_specs=pl.BlockSpec((bb, d), lambda i: (i, 0)),
        # Output aliases the donated input buffer: no extra HBM allocation /
        # no separate output writeback target for the identity scaffold.
        input_output_aliases={0: 0},
        compiler_params=pltpu.CompilerParams(
            # Batch axis is embarrassingly parallel -> both TensorCores on v7x.
            dimension_semantics=("parallel",),
        ),
    )(ctx)


def context_passthrough(ctx: jax.Array, *, block_rows: int = 128) -> jax.Array:
    """Run the (no-op) context-encoding hot path through a Pallas kernel.

    The input buffer is donated and aliased to the output, so the identity
    scaffold adds no fresh HBM allocation.
    """
    fn = jax.jit(_passthrough_impl, static_argnums=(1,), donate_argnums=(0,))
    return fn(ctx, block_rows)


class ContextEncoder:
    """JAX mirror of the PyTorch ContextEncoder stub (no params, no inputs)."""

    def __init__(self, dim: int):
        self.dim = dim  # no parameters in the reference module

    def forward(self):
        # Exact semantics of the PyTorch module: `return` -> None.
        return None

    __call__ = forward


if __name__ == "__main__":
    key = jax.random.PRNGKey(0)

    dim = 128     # lane-dense last dim (multiple of 128)
    batch = 256   # small, but enough rows for a multi-block "parallel" grid

    # Instantiate the module and verify the faithful (no-op) forward.
    enc = ContextEncoder(dim)
    assert enc.forward() is None

    # Activation-dtype (bf16) context tensor: the pass-through is purely
    # HBM-bandwidth bound, so the narrower dtype halves bytes moved.
    ctx = jax.random.normal(key, (batch, dim), dtype=jnp.float32).astype(jnp.bfloat16)
    expected = jnp.copy(ctx)   # snapshot before the buffer is donated

    out = context_passthrough(ctx)
    out = jax.block_until_ready(out)

    assert out.shape == (batch, dim)
    assert out.dtype == jnp.bfloat16
    assert bool(jnp.array_equal(out, expected))

    print("KERNEL_OK")
</pallas_src>

<mosaic_0001>
module attributes {stable_mosaic.version = 11 : i64} {
  func.func @_context_identity_kernel(%arg0: i32, %arg1: memref<128x128xbf16, #tpu.memory_space<vmem>>, %arg2: memref<128x128xbf16, #tpu.memory_space<vmem>>) attributes {dimension_semantics = [#tpu.dimension_semantics<parallel>], iteration_bounds = array<i64: 2>, scalar_prefetch = 0 : i64, scratch_operands = 0 : i64, tpu.core_type = #tpu.core_type<tc>, window_params = [{transform_indices = @transform_0, window_bounds = array<i64: 128, 128>}, {transform_indices = @transform_1, window_bounds = array<i64: 128, 128>}]} {
    %c0 = arith.constant 0 : index
    %c0_0 = arith.constant 0 : index
    %0 = vector.load %arg1[%c0, %c0_0] : memref<128x128xbf16, #tpu.memory_space<vmem>>, vector<128x128xbf16>
    %c0_1 = arith.constant 0 : index
    %c0_2 = arith.constant 0 : index
    %1 = vector.load %arg2[%c0_1, %c0_2] : memref<128x128xbf16, #tpu.memory_space<vmem>>, vector<128x128xbf16>
    tpu.vector_store %arg2[%c0_1, %c0_2], %0 {strides = array<i32>} : memref<128x128xbf16, #tpu.memory_space<vmem>>, vector<128x128xbf16>,
    return
  }
  func.func @transform_0(%arg0: i32) -> (i32, i32) {
    %c0_i32 = arith.constant 0 : i32
    %c0_i32_0 = arith.constant 0 : i32
    return %arg0, %c0_i32 : i32, i32
  }
  func.func @transform_1(%arg0: i32) -> (i32, i32) {
    %c0_i32 = arith.constant 0 : i32
    %c0_i32_0 = arith.constant 0 : i32
    return %arg0, %c0_i32 : i32, i32
  }
}

</mosaic_0001>

<bundles_post_ra>
// kernel: _passthrough_impl.1
= control target key start
LH: loop header
LB: loop body
LE: loop exit
PB: predicated region body
PF: predicated region fallthrough
CT: control target
= control target key end

     0   :  { %6 = vsyncpa [#allocation3], 0  ;;  %s598_s0 = inlined_call_operand.hbm [shape: bf16[256,128], index: 0, kind: input, shape index: {}, may-alias: {0,1}]   ;;  %s599_s1 = inlined_call_operand.hbm [shape: bf16[256,128], index: 1, kind: output, shape index: {}, may-alias: {0,1}]  }
   0x1   :  { %8 = vsyncpa [#allocation3 + $0x1], 0 }
   0x2   :  { %9 = vsyncpa [#allocation4], 0 }
   0x3   :  { %11 = vsyncpa [#allocation4 + $0x1], 0  ;;  %s436_s6 = smov 0   ;;  %s438_s7 = smov 0  }
   0x4   :  { %s440_s8 = smov 0   ;;  %s442_s9 = smov 0  }
   0x5 LB: > { %s457_s10 = sadd.s32 4294967295, %s418_s9   ;;  %s256_s11 = sadd.s32 4294967294, %s418_s9   ;;  %s418_s9 = sphi %s442_s9, %s612_s9   ;;  %s414_s8 = sphi %s440_s8, %s611_s8   ;;  %s410_s7 = sphi %s438_s7, %s610_s7   ;;  %s406_s6 = sphi %s436_s6, %s609_s6  }
   0x6   : > { %s461_s12 = sadd.s32 1, %s418_s9   ;;  %s24_s13 = sadd.s32 1, %s414_s8 }
   0x7   : > { %s21_s14 = ssub.s32 %s418_s9, %s461_s12  ;;  %p31_p0 = scmp.ne.s32.totalorder %s414_s8, %s410_s7 }
   0x8   : > { %p22_p1 = scmp.eq.s32.totalorder %s21_s14, 0  ;;  %p32_p2 = scmp.eq.s32.totalorder %s418_s9, 0 }
   0x9   : > { %p37_p3 = scmp.ne.s32.totalorder %s410_s7, %s406_s6  ;;  %p38_p4 = scmp.eq.s32.totalorder %s457_s10, 0 }
   0xa   : > { %s473_s15 = scalar_select %p22_p1, %s414_s8, %s24_s13  }
   0xb   : > { %p475_p5 = por %p32_p2, %p31_p0  ;;  %p479_p6 = por %p38_p4, %p37_p3 }
   0xc   : > { %p61_p7 = scmp.eq.s32.totalorder %s457_s10, 1  ;;  %p67_p8 = scmp.eq.s32.totalorder %s256_s11, 1 }
   0xd   : > { %p284_p10 = scmp.lt.s32.totalorder %s418_s9, 2  ;;  %s87_s20 = sand.u32 1, %s414_s8  }
   0xe   : > { %p486_p11 = por %p61_p7, %p31_p0  ;;  %p490_p12 = por %p67_p8, %p37_p3 }
   0xf   : > { %s270_s21 = sshll.u32 %s418_s9, 10  ;;  %s259_s22 = sshll.u32 %s87_s20, 6 }
  0x10   : > { %s603_s18 = scalar_select %p486_p11, 1, 0 }
  0x11   : > { %s604_s19 = scalar_select %p490_p12, 1, 0 }
  0x12   : > { %s499_s25 = scalar_lea.hbm %s598_s0, %s270_s21  ;;  %s91_s26 = scalar_lea.vmem [#allocation2], %s259_s22 }
  0x13   : > { %s98_s27 = sshll.u32 %s91_s26, 4  ;;  %p503_p13 = pnand %p284_p10, %p475_p5  ;;  %s507_s27 = int_to_ptr.vmem [resolvable:$true] %s98_s27 }
  0x14   : > { %s509_s29 = scalar_lea.sflag [#allocation3], %s87_s20  ;;  %s322_s30 = scalar_lea.hbm %s499_s25, 1024 }
  0x15   : > { %p323_p0 = scmp.ne.s32.totalorder %s499_s25, %s322_s30  ;;  %p324_p1 = pneg %p503_p13 }
  0x16   : > { %s327_s4 = scalar_lea.hbm %s598_s0, 2048  ;;  %p328_p4 = scmp.lt.u32.totalorder %s499_s25, %s598_s0 }
  0x17   : > { %p325_p2 = pnand %p324_p1, %p323_p0  ;;  %p329_p5 = scmp.lt.u32.totalorder %s327_s4, %s322_s30 }
  0x18   : > { %p331_p8 = scmp.lt.u32.totalorder %s322_s30, %s499_s25 }
  0x19   : > { %p326_p3 = pneg %p325_p2  ;;  %p330_p7 = por %p329_p5, %p328_p4 }
  0x1b   : > { %p332_p10 = por %p331_p8, %p330_p7 }
  0x1d   : > { %p333_p9 = pnand %p332_p10, %p326_p3 }
  0x1f   : > { %336 = shalt.err (!%p333_p9)
}
  0x20   : > { %s337_s13 = scalar_lea.vmem %s507_s27, 1024  ;;  %s420_s14 = smov [#allocation2]  }
  0x21   : > { %p338_p0 = scmp.ne.s32.totalorder %s507_s27, %s337_s13  ;;  %s342_s16 = sshll.u32 %s420_s14, 4  ;;  %s343_s16 = int_to_ptr.vmem [resolvable:$false] %s342_s16 }
  0x22   : > { %s344_s20 = scalar_lea.vmem %s343_s16, 2048  ;;  %p345_p11 = scmp.lt.s32.totalorder %s507_s27, %s343_s16 }
  0x23   : > { %p340_p2 = pnand %p338_p0, %p324_p1  ;;  %p346_p4 = scmp.lt.s32.totalorder %s344_s20, %s337_s13 }
  0x25   : > { %p341_p12 = pneg %p340_p2  ;;  %p347_p5 = por %p346_p4, %p345_p11 }
  0x27   : > { %p348_p7 = pnand %p347_p5, %p341_p12 }
  0x29   : > { %351 = shalt.err (!%p348_p7)
}
  0x2a   : > { %s421_s21 = smov 64   ;;  %s422_s22 = smov 4  }
  0x2b   : > { %279 = dma.hbm_to_vmem [thread:$0]  (!%p503_p13), %s499_s25, 1024, %s507_s27, %s509_s29, %s421_s21, %s421_s21, %s422_s22  }
  0x2c   : > { %p262_p9 = scmp.ge.s32.totalorder %s418_s9, 1  ;;  %p106_p1 = scmp.lt.s32.totalorder %s418_s9, 3 }
  0x2e   : > { %p107_p3 = pnand %p262_p9, %p106_p1 }
  0x2f   : > { %s540_s23 = sand.u32 (!%p107_p3), 1, %s410_s7  }
  0x30   : > { %110 = sbr.rel (%p107_p3) target bundleno = 83 (0x53), region = 24  ;;  %s263_s24 = sshll.u32 (!%p107_p3), %s540_s23, 6 }
  0x31   : > { %s113_s26 = scalar_lea.sflag (!%p107_p3), [#allocation3], %s540_s23  ;;  %s116_s30 = scalar_lea.vmem (!%p107_p3), [#allocation2], %s263_s24 }
  0x37   : > { %397 = dma.done.wait (%p479_p6), %s113_s26, 1024  }
  0x38   : > { %399 = vsyncadd (%p479_p6), %s113_s26, 4294966272  ;;  %s271_s25 = sshll.u32 %s457_s10, 10  ;;  %s134_s27 = scalar_lea.vmem [#allocation5], %s263_s24  ;;  %v137_v0 = vld [vmem:[%s116_s30] sm:$0xff]   ;;  %v139_v1 = vld [vmem:[%s116_s30 + $0x8] sm:$0xff]  }
  0x39   : > { %s183_s28 = sshll.u32 %s134_s27, 4  ;;  %v141_v2 = vld [vmem:[%s116_s30 + $0x10] sm:$0xff]   ;;  %s552_s3 = scalar_lea.hbm %s599_s1, %s271_s25  ;;  %153 = vst [vmem:[%s134_s27] sm:$0xff] %v137_v0   ;;  %155 = vst [vmem:[%s134_s27 + $0x8] sm:$0xff] %v139_v1   ;;  %v143_v3 = vld [vmem:[%s116_s30 + $0x18] sm:$0xff]   ;;  %s554_s28 = int_to_ptr.vmem [resolvable:$true] %s183_s28 }
  0x3a   : > { %157 = vst [vmem:[%s134_s27 + $0x10] sm:$0xff] %v141_v2   ;;  %v145_v4 = vld [vmem:[%s116_s30 + $0x20] sm:$0xff]   ;;  %v147_v5 = vld [vmem:[%s116_s30 + $0x28] sm:$0xff]   ;;  %159 = vst [vmem:[%s134_s27 + $0x18] sm:$0xff] %v143_v3   ;;  %s170_s10 = scalar_lea.sflag [#allocation4], %s540_s23  ;;  %s352_s17 = scalar_lea.vmem %s554_s28, 1024 }
  0x3b   : > { %161 = vst [vmem:[%s134_s27 + $0x20] sm:$0xff] %v145_v4   ;;  %163 = vst [vmem:[%s134_s27 + $0x28] sm:$0xff] %v147_v5   ;;  %v149_v6 = vld [vmem:[%s116_s30 + $0x30] sm:$0xff]   ;;  %v151_v7 = vld [vmem:[%s116_s30 + $0x38] sm:$0xff]   ;;  %p353_p6 = scmp.ne.s32.totalorder %s554_s28, %s352_s17  ;;  %p606_p11 = scmp.ne.s32.totalorder %s603_s18, 0 }
  0x3c   : > { %165 = vst [vmem:[%s134_s27 + $0x30] sm:$0xff] %v149_v6   ;;  %167 = vst [vmem:[%s134_s27 + $0x38] sm:$0xff] %v151_v7   ;;  %s423_s4 = smov [#allocation5]  }
  0x3d   : > { %p354_p12 = pnand %p353_p6, %p606_p11  ;;  %s356_s5 = sshll.u32 %s423_s4, 4  ;;  %s357_s5 = int_to_ptr.vmem [resolvable:$false] %s356_s5 }
  0x3e   : > { %s358_s11 = scalar_lea.vmem %s357_s5, 2048  ;;  %p359_p8 = scmp.lt.s32.totalorder %s554_s28, %s357_s5 }
  0x3f   : > { %p355_p13 = pneg %p354_p12  ;;  %p360_p10 = scmp.lt.s32.totalorder %s358_s11, %s352_s17 }
  0x41   : > { %p361_p0 = por %p360_p10, %p359_p8 }
  0x43   : > { %p362_p2 = pnand %p361_p0, %p355_p13 }
  0x45   : > { %365 = shalt.err (!%p362_p2)
}
  0x46   : > { %s366_s13 = scalar_lea.hbm %s552_s3, 1024  ;;  %s370_s20 = scalar_lea.hbm %s599_s1, 2048 }
  0x47   : > { %p367_p4 = scmp.ne.s32.totalorder %s552_s3, %s366_s13  ;;  %p371_p9 = scmp.lt.u32.totalorder %s552_s3, %s599_s1 }
  0x48   : > { %p372_p1 = scmp.lt.u32.totalorder %s370_s20, %s366_s13  ;;  %p374_p6 = scmp.lt.u32.totalorder %s366_s13, %s552_s3 }
  0x49   : > { %p368_p5 = pnand %p367_p4, %p606_p11 }
  0x4a   : > { %p373_p3 = por %p372_p1, %p371_p9 }
  0x4b   : > { %p369_p7 = pneg %p368_p5 }
  0x4c   : > { %p375_p12 = por %p374_p6, %p373_p3 }
  0x4e   : > { %p376_p13 = pnand %p375_p12, %p369_p7 }
  0x50   : > { %379 = shalt.err (!%p376_p13)
}
  0x51   : > { %s424_s24 = smov 64   ;;  %s425_s26 = smov 4  }
  0x52   : > { %274 = dma.vmem_to_hbm [thread:$0]  (%p606_p11), %s554_s28, 1024, %s552_s3, %s170_s10, %s424_s24, %s424_s24, %s425_s26  }
  0x53 PF: > { %s198_s30 = sand.u32 1, %s406_s6   ;;  %p607_p8 = scmp.ne.s32.totalorder %s604_s19, 0 }
  0x54   : > { %p608_p10 = scmp.ge.s32.totalorder %s418_s9, 2  ;;  %s199_s25 = scalar_lea.sflag [#allocation4], %s198_s30 }
  0x56   : > { %p281_p0 = pnand %p608_p10, %p607_p8 }
  0x58   : > { %401 = dma.done.wait (!%p281_p0), %s199_s25, 1024  }
  0x59   : > { %403 = vsyncadd (!%p281_p0), %s199_s25, 4294966272  ;;  %p14_p2 = scmp.ge.s32.totalorder %s461_s12, 4   ;;  %s609_s6 = smov %s410_s7 }
  0x5a   : > { %s610_s7 = smov %s414_s8  ;;  %s611_s8 = smov %s473_s15 }
  0x5b   : > { %s612_s9 = smov %s461_s12  ;;  %16 = sbr.rel (!%p14_p2) target bundleno = 5 (0x5), region = 69 }
  0x62   :  { %204 = vsyncpa [#allocation3], 1 }
  0x63   :  { %206 = vsyncpa [#allocation3 + $0x1], 1 }
  0x64   :  { %207 = vsyncpa [#allocation4], 1 }
  0x65   :  { %209 = vsyncpa [#allocation4 + $0x1], 1 }

</bundles_post_ra>
